<compile_context>
chip_gen: v7x
topology: tpu7x:2x2x1
jax: 0.10.0
libtpu: 0.0.40
codegen_flags: <defaults>
</compile_context>

<pallas_src>
import functools

import numpy as np
import jax
import jax.numpy as jnp
from jax.experimental import pallas as pl
from jax.experimental.pallas import tpu as pltpu


# --------------------------- fused forward kernel ---------------------------
def _marble_fused_kernel(*refs, order, sig_dim, emb_dim):
    it = iter(refs)
    x_ref = next(it)                                   # (n, s)    signal (global frame)
    gf_ref = next(it)                                  # (n, s*d)  gauges, lane-flattened
    ks_ref = next(it)                                  # (d*n, n)  stacked [K_0; K_1; ...]
    e_refs = [next(it) for _ in range(order)]          # (d, c_i, c_i*d) column scatters
    of_refs = [next(it) for _ in range(order + 1)]     # (D, w_b)  O_j blocks
    s_refs = [next(it) for _ in range(order + 1)]      # (w_b, C)  group-sum selectors
    w1t_ref = next(it)                                 # (C, hidden)
    b1_ref = next(it)                                  # (1, hidden)
    gamma_ref = next(it)                               # (1, hidden)
    beta_ref = next(it)                                # (1, hidden)
    w2t_ref = next(it)                                 # (hidden, out)
    b2_ref = next(it)                                  # (1, out)
    out_ref = next(it)                                 # (n, out)

    n = x_ref.shape[0]
    s = sig_dim
    d = emb_dim

    # ---- (1) gauge projection: x0[b, j] = sum_i gauges[b, i, j] * x[b, i]
    #      gf lane layout: gf[:, i*d + j] = gauges[:, i, j]  (pure lane slices)
    xin = x_ref[...]
    gf = gf_ref[...]
    x0 = gf[:, 0:d] * xin[:, 0:1]
    for i in range(1, s):
        x0 = x0 + gf[:, i * d:(i + 1) * d] * xin[:, i:i + 1]

    # ---- (2) AnisoConv chain (include_self=True, vec_norm=False)
    #      one stacked MXU matmul per order; column scatter via selector
    #      matmuls reproduces torch's stack(dirs, axis=2).view(n, -1)
    #      (col = chan*d + dir).  n % 8 == 0 keeps the row-block slices aligned.
    ks = ks_ref[...]                                   # (d*n, n)
    feats = [x0]
    x_cur = x0
    for step in range(order):
        y = jnp.dot(ks, x_cur, preferred_element_type=jnp.float32)     # (d*n, c)
        e = e_refs[step]
        x_next = jnp.dot(y[0:n, :], e[0], preferred_element_type=jnp.float32)
        for g in range(1, d):
            x_next = x_next + jnp.dot(y[g * n:(g + 1) * n, :], e[g],
                                      preferred_element_type=jnp.float32)
        feats.append(x_next)
        x_cur = x_next

    # ---- (3) InnerProductFeatures: ip[b, j] = tanh(<O_j x_j, x_0>)
    ip = None
    for f, of_r, s_r in zip(feats, of_refs, s_refs):
        a = jnp.dot(x0, of_r[...], preferred_element_type=jnp.float32)          # (n, w_b)
        contrib = jnp.dot(f * a, s_r[...], preferred_element_type=jnp.float32)  # (n, C)
        ip = contrib if ip is None else ip + contrib
    ip = jnp.tanh(ip)

    # ---- (4) MLP encoder: Linear -> BatchNorm(batch stats) -> ReLU -> Linear
    h = jnp.dot(ip, w1t_ref[...], preferred_element_type=jnp.float32) + b1_ref[...]
    mu = jnp.mean(h, axis=0, keepdims=True)
    var = jnp.mean(h * h, axis=0, keepdims=True) - mu * mu      # one-pass variance
    h = (h - mu) * (gamma_ref[...] * jax.lax.rsqrt(var + 1e-5)) + beta_ref[...]
    h = jnp.maximum(h, 0.0)                             # ReLU; dropout=0. by default
    out_ref[...] = jnp.dot(h, w2t_ref[...],
                           preferred_element_type=jnp.float32) + b2_ref[...]


# --------------------------- architecture constants -------------------------
def build_marble_constants(O_mats, dim_emb, order):
    """Constants of the architecture — build ONCE, not per forward call."""
    O = np.asarray(O_mats, dtype=np.float32)
    C, D, _ = O.shape
    d = dim_emb
    assert C == sum(d ** b for b in range(order + 1)), "channel count mismatch"

    # column-scatter selectors: fold the d row-blocks of Ks @ x into the torch
    # AnisoConv column layout (col = channel*d + direction) with matmuls.
    e_list = []
    c = D
    for _ in range(order):
        E = np.zeros((d, c, c * d), dtype=np.float32)
        ch = np.arange(c)
        for g in range(d):
            E[g, ch, ch * d + g] = 1.0
        e_list.append(jnp.asarray(E))
        c *= d

    # inner-product constants, split per derivative-order feature block.
    Of = np.transpose(O, (1, 0, 2)).reshape(D, C * D)      # Of[k, j*D+l] = O[j,k,l]
    S = np.repeat(np.eye(C, dtype=np.float32), D, axis=0)  # sum D comps of channel j
    widths = [D * d ** b for b in range(order + 1)]
    offs = np.concatenate([[0], np.cumsum(widths)[:-1]])
    of_blocks = [jnp.asarray(Of[:, o:o + w]) for o, w in zip(offs, widths)]
    s_blocks = [jnp.asarray(S[o:o + w, :]) for o, w in zip(offs, widths)]
    return e_list, of_blocks, s_blocks


def prepare_mlp_params(params):
    """Pre-transpose / pre-broadcast the MLP parameters ONCE (not per call)."""
    return {
        "w1t": jnp.asarray(params["w1"]).T,
        "b1": jnp.asarray(params["b1"])[None, :],
        "gamma": jnp.asarray(params["gamma"])[None, :],
        "beta": jnp.asarray(params["beta"])[None, :],
        "w2t": jnp.asarray(params["w2"]).T,
        "b2": jnp.asarray(params["b2"])[None, :],
    }


# --------------------------- net.forward (default-params path) --------------
def marble_forward(data, n_id, *, order, consts, mlp):
    """Graph-batched forward.  Leading axis B = independent graphs/minibatches.

    data["x"]:       (B, n, s)    signal
    data["gauges"]:  (B, n, s, d) local frames
    data["kernels"]: (B, d, n, n) directional-derivative operators
    data["mask"]:    (B, n)
    """
    # TODO(synk): diffusion layer skipped (params['diffusion'] = False by default).
    x = data["x"][:, n_id]
    gauges = data["gauges"][:, n_id]
    mask = data["mask"][:, n_id]

    B, n, s = x.shape
    d = gauges.shape[3]
    # sublane-aligned per-direction row blocks; pad graphs to a multiple of 8
    assert n % 8 == 0, "node count must be a multiple of 8 (pad the graph)"

    gf = gauges.reshape(B, n, s * d)        # lane-flat gauges (contiguous reshape)
    # TODO(synk): kernel slicing K[n_id,:][:,n_id] omitted — identity on the
    # full-graph transform() path (n_id = arange(n), all adj sizes == (n, n)).
    ks = data["kernels"].reshape(B, d * n, n)   # vertical stack [K_0; K_1; ...]

    e_list, of_blocks, s_blocks = consts
    out_ch = mlp["w2t"].shape[1]

    def per_graph(shape):                   # one block per graph along the grid
        return pl.BlockSpec((None,) + shape, lambda b: (b,) + (0,) * len(shape))

    def shared(arr):                        # same block for every grid step
        shp = arr.shape
        return pl.BlockSpec(shp, lambda b, _n=len(shp): (0,) * _n)

    in_specs = [per_graph((n, s)), per_graph((n, s * d)), per_graph((d * n, n))]
    in_specs += [shared(e) for e in e_list]
    in_specs += [shared(o) for o in of_blocks]
    in_specs += [shared(sb) for sb in s_blocks]
    in_specs += [shared(mlp["w1t"]), shared(mlp["b1"]), shared(mlp["gamma"]),
                 shared(mlp["beta"]), shared(mlp["w2t"]), shared(mlp["b2"])]

    emb = pl.pallas_call(
        functools.partial(_marble_fused_kernel, order=order, sig_dim=s, emb_dim=d),
        grid=(B,),
        in_specs=in_specs,
        out_specs=per_graph((n, out_ch)),
        out_shape=jax.ShapeDtypeStruct((B, n, out_ch), jnp.float32),
        compiler_params=pltpu.CompilerParams(
            dimension_semantics=("parallel",)),
    )(x, gf, ks, *e_list, *of_blocks, *s_blocks,
      mlp["w1t"], mlp["b1"], mlp["gamma"], mlp["beta"], mlp["w2t"], mlp["b2"])

    # emb_norm=False, include_positions=False; last adj size == n
    return emb, mask


# --------------------------- pure-JAX reference (single graph) --------------
def marble_reference(data, n_id, *, order, params):
    hp = jax.lax.Precision.HIGHEST
    x = jnp.einsum("bij,bi->bj", data["gauges"], data["x"], precision=hp)
    x = x[n_id]
    mask = data["mask"][n_id]
    n = x.shape[0]
    d = data["gauges"].shape[2]
    K = data["kernels"]
    out = [x]
    for _ in range(order):
        ys = [jnp.dot(K[g], x, precision=hp) for g in range(d)]
        x = jnp.stack(ys, axis=2).reshape(n, -1)
        out.append(x)
    O = params["O"]
    C, D, _ = O.shape
    xf = jnp.concatenate([o.reshape(n, -1, D) for o in out], axis=1)   # (n, C, D)
    Ox = jnp.einsum("jkl,bjl->bjk", O, xf, precision=hp)
    ip = jnp.tanh(jnp.einsum("bjk,bk->bj", Ox, xf[:, 0, :], precision=hp))
    h = jnp.dot(ip, params["w1"].T, precision=hp) + params["b1"]
    mu = h.mean(0, keepdims=True)
    var = ((h - mu) ** 2).mean(0, keepdims=True)
    h = (h - mu) * jax.lax.rsqrt(var + 1e-5) * params["gamma"] + params["beta"]
    h = jnp.maximum(h, 0.0)
    emb = jnp.dot(h, params["w2"].T, precision=hp) + params["b2"]
    return emb, mask


if __name__ == "__main__":
    B, n, s, d, order = 2, 32, 3, 3, 2        # dim_signal = dim_emb = 3, order = 2
    hidden, out_channels = 16, 3
    C = s * (1 - d ** (order + 1)) // (1 - d) // s   # cum_channels // s = 13

    key = jax.random.PRNGKey(0)
    k1, k2, k3, k4, k5, k6, k7, k8 = jax.random.split(key, 8)

    data = {
        "x": jax.random.normal(k1, (B, n, s), jnp.float32),
        "gauges": jax.random.normal(k8, (B, n, s, d), jnp.float32) * 0.5,
        "kernels": jax.random.normal(k2, (B, d, n, n), jnp.float32) / n,
        "mask": jax.random.bernoulli(k3, 0.5, (B, n)),
    }
    params = {
        # InnerProductFeatures: O_j = I_D (default reset)
        "O": jnp.tile(jnp.eye(s, dtype=jnp.float32)[None], (C, 1, 1)),
        "w1": jax.random.normal(k4, (hidden, C), jnp.float32) * 0.1,
        "b1": jax.random.normal(k5, (hidden,), jnp.float32) * 0.1,
        "gamma": jnp.ones((hidden,), jnp.float32),
        "beta": jnp.zeros((hidden,), jnp.float32),
        "w2": jax.random.normal(k6, (out_channels, hidden), jnp.float32) * 0.1,
        "b2": jax.random.normal(k7, (out_channels,), jnp.float32) * 0.1,
    }

    consts = build_marble_constants(params["O"], d, order)   # built once
    mlp = prepare_mlp_params(params)                          # built once
    n_id = jnp.arange(n)

    fwd = jax.jit(functools.partial(marble_forward, order=order,
                                    consts=consts, mlp=mlp))
    emb, mask = fwd(data, n_id)
    jax.block_until_ready(emb)
    assert emb.shape == (B, n, out_channels) and mask.shape == (B, n)

    for b in range(B):
        data_b = {k: v[b] for k, v in data.items()}
        emb_ref, _ = marble_reference(data_b, n_id, order=order, params=params)
        err = float(jnp.max(jnp.abs(emb[b] - emb_ref)))
        assert jnp.allclose(emb[b], emb_ref, atol=5e-2, rtol=5e-2), \
            f"graph {b}: max |diff| = {err}"
    print("KERNEL_OK")
</pallas_src>

<mosaic_0001>
module attributes {stable_mosaic.version = 11 : i64} {
  func.func @_marble_fused_kernel(%arg0: i32, %arg1: memref<1x32x3xf32, #tpu.memory_space<vmem>>, %arg2: memref<1x32x9xf32, #tpu.memory_space<vmem>>, %arg3: memref<1x96x32xf32, #tpu.memory_space<vmem>>, %arg4: memref<3x3x9xf32, #tpu.memory_space<vmem>>, %arg5: memref<3x9x27xf32, #tpu.memory_space<vmem>>, %arg6: memref<3x3xf32, #tpu.memory_space<vmem>>, %arg7: memref<3x9xf32, #tpu.memory_space<vmem>>, %arg8: memref<3x27xf32, #tpu.memory_space<vmem>>, %arg9: memref<3x13xf32, #tpu.memory_space<vmem>>, %arg10: memref<9x13xf32, #tpu.memory_space<vmem>>, %arg11: memref<27x13xf32, #tpu.memory_space<vmem>>, %arg12: memref<13x16xf32, #tpu.memory_space<vmem>>, %arg13: memref<1x16xf32, #tpu.memory_space<vmem>>, %arg14: memref<1x16xf32, #tpu.memory_space<vmem>>, %arg15: memref<1x16xf32, #tpu.memory_space<vmem>>, %arg16: memref<16x3xf32, #tpu.memory_space<vmem>>, %arg17: memref<1x3xf32, #tpu.memory_space<vmem>>, %arg18: memref<1x32x3xf32, #tpu.memory_space<vmem>>) attributes {dimension_semantics = [#tpu.dimension_semantics<parallel>], iteration_bounds = array<i64: 2>, scalar_prefetch = 0 : i64, scratch_operands = 0 : i64, tpu.core_type = #tpu.core_type<tc>, window_params = [{transform_indices = @transform_0, window_bounds = array<i64: 1, 32, 3>}, {transform_indices = @transform_1, window_bounds = array<i64: 1, 32, 9>}, {transform_indices = @transform_2, window_bounds = array<i64: 1, 96, 32>}, {pipeline_mode = #tpu.pipeline_mode<synchronous>, transform_indices = @transform_3, window_bounds = array<i64: 3, 3, 9>}, {pipeline_mode = #tpu.pipeline_mode<synchronous>, transform_indices = @transform_4, window_bounds = array<i64: 3, 9, 27>}, {pipeline_mode = #tpu.pipeline_mode<synchronous>, transform_indices = @transform_5, window_bounds = array<i64: 3, 3>}, {pipeline_mode = #tpu.pipeline_mode<synchronous>, transform_indices = @transform_6, window_bounds = array<i64: 3, 9>}, {pipeline_mode = #tpu.pipeline_mode<synchronous>, transform_indices = @transform_7, window_bounds = array<i64: 3, 27>}, {pipeline_mode = #tpu.pipeline_mode<synchronous>, transform_indices = @transform_8, window_bounds = array<i64: 3, 13>}, {pipeline_mode = #tpu.pipeline_mode<synchronous>, transform_indices = @transform_9, window_bounds = array<i64: 9, 13>}, {pipeline_mode = #tpu.pipeline_mode<synchronous>, transform_indices = @transform_10, window_bounds = array<i64: 27, 13>}, {pipeline_mode = #tpu.pipeline_mode<synchronous>, transform_indices = @transform_11, window_bounds = array<i64: 13, 16>}, {pipeline_mode = #tpu.pipeline_mode<synchronous>, transform_indices = @transform_12, window_bounds = array<i64: 1, 16>}, {pipeline_mode = #tpu.pipeline_mode<synchronous>, transform_indices = @transform_13, window_bounds = array<i64: 1, 16>}, {pipeline_mode = #tpu.pipeline_mode<synchronous>, transform_indices = @transform_14, window_bounds = array<i64: 1, 16>}, {pipeline_mode = #tpu.pipeline_mode<synchronous>, transform_indices = @transform_15, window_bounds = array<i64: 16, 3>}, {pipeline_mode = #tpu.pipeline_mode<synchronous>, transform_indices = @transform_16, window_bounds = array<i64: 1, 3>}, {transform_indices = @transform_17, window_bounds = array<i64: 1, 32, 3>}]} {
    %c0 = arith.constant 0 : index
    %c0_0 = arith.constant 0 : index
    %c0_1 = arith.constant 0 : index
    %0 = vector.load %arg1[%c0, %c0_0, %c0_1] : memref<1x32x3xf32, #tpu.memory_space<vmem>>, vector<1x32x3xf32>
    %1 = vector.shape_cast %0 : vector<1x32x3xf32> to vector<32x3xf32>
    %c0_2 = arith.constant 0 : index
    %c0_3 = arith.constant 0 : index
    %c0_4 = arith.constant 0 : index
    %2 = vector.load %arg2[%c0_2, %c0_3, %c0_4] : memref<1x32x9xf32, #tpu.memory_space<vmem>>, vector<1x32x9xf32>
    %3 = vector.shape_cast %2 : vector<1x32x9xf32> to vector<32x9xf32>
    %4 = vector.extract_strided_slice %3 {offsets = [0, 0], sizes = [32, 3], strides = [1, 1]} : vector<32x9xf32> to vector<32x3xf32>
    %5 = vector.extract_strided_slice %1 {offsets = [0, 0], sizes = [32, 1], strides = [1, 1]} : vector<32x3xf32> to vector<32x1xf32>
    %6 = vector.broadcast %5 : vector<32x1xf32> to vector<32x3xf32>
    %7 = arith.mulf %4, %6 : vector<32x3xf32>
    %8 = vector.extract_strided_slice %3 {offsets = [0, 3], sizes = [32, 3], strides = [1, 1]} : vector<32x9xf32> to vector<32x3xf32>
    %9 = vector.extract_strided_slice %1 {offsets = [0, 1], sizes = [32, 1], strides = [1, 1]} : vector<32x3xf32> to vector<32x1xf32>
    %10 = vector.broadcast %9 : vector<32x1xf32> to vector<32x3xf32>
    %11 = arith.mulf %8, %10 : vector<32x3xf32>
    %12 = arith.addf %7, %11 : vector<32x3xf32>
    %13 = vector.extract_strided_slice %3 {offsets = [0, 6], sizes = [32, 3], strides = [1, 1]} : vector<32x9xf32> to vector<32x3xf32>
    %14 = vector.extract_strided_slice %1 {offsets = [0, 2], sizes = [32, 1], strides = [1, 1]} : vector<32x3xf32> to vector<32x1xf32>
    %15 = vector.broadcast %14 : vector<32x1xf32> to vector<32x3xf32>
    %16 = arith.mulf %13, %15 : vector<32x3xf32>
    %17 = arith.addf %12, %16 : vector<32x3xf32>
    %c0_5 = arith.constant 0 : index
    %c0_6 = arith.constant 0 : index
    %c0_7 = arith.constant 0 : index
    %18 = vector.load %arg3[%c0_5, %c0_6, %c0_7] : memref<1x96x32xf32, #tpu.memory_space<vmem>>, vector<1x96x32xf32>
    %19 = vector.shape_cast %18 : vector<1x96x32xf32> to vector<96x32xf32>
    %cst = arith.constant dense<0.000000e+00> : vector<96x3xf32>
    %20 = tpu.matmul %19, %17, %cst {dimension_numbers = #tpu.dot_dimension_numbers<[1], [0], [0], [1], [0, 0, 1, 1], [], []>} : vector<96x32xf32>, vector<32x3xf32>, vector<96x3xf32> -> vector<96x3xf32>
    %21 = vector.extract_strided_slice %20 {offsets = [0, 0], sizes = [32, 3], strides = [1, 1]} : vector<96x3xf32> to vector<32x3xf32>
    %c0_8 = arith.constant 0 : index
    %c0_9 = arith.constant 0 : index
    %c0_10 = arith.constant 0 : index
    %22 = vector.load %arg4[%c0_8, %c0_9, %c0_10] : memref<3x3x9xf32, #tpu.memory_space<vmem>>, vector<1x3x9xf32>
    %23 = vector.shape_cast %22 : vector<1x3x9xf32> to vector<3x9xf32>
    %cst_11 = arith.constant dense<0.000000e+00> : vector<32x9xf32>
    %24 = tpu.matmul %21, %23, %cst_11 {dimension_numbers = #tpu.dot_dimension_numbers<[1], [0], [0], [1], [0, 0, 1, 1], [], []>} : vector<32x3xf32>, vector<3x9xf32>, vector<32x9xf32> -> vector<32x9xf32>
    %25 = vector.extract_strided_slice %20 {offsets = [32, 0], sizes = [32, 3], strides = [1, 1]} : vector<96x3xf32> to vector<32x3xf32>
    %c1 = arith.constant 1 : index
    %c0_12 = arith.constant 0 : index
    %c0_13 = arith.constant 0 : index
    %26 = vector.load %arg4[%c1, %c0_12, %c0_13] : memref<3x3x9xf32, #tpu.memory_space<vmem>>, vector<1x3x9xf32>
    %27 = vector.shape_cast %26 : vector<1x3x9xf32> to vector<3x9xf32>
    %cst_14 = arith.constant dense<0.000000e+00> : vector<32x9xf32>
    %28 = tpu.matmul %25, %27, %cst_14 {dimension_numbers = #tpu.dot_dimension_numbers<[1], [0], [0], [1], [0, 0, 1, 1], [], []>} : vector<32x3xf32>, vector<3x9xf32>, vector<32x9xf32> -> vector<32x9xf32>
    %29 = arith.addf %24, %28 : vector<32x9xf32>
    %30 = vector.extract_strided_slice %20 {offsets = [64, 0], sizes = [32, 3], strides = [1, 1]} : vector<96x3xf32> to vector<32x3xf32>
    %c2 = arith.constant 2 : index
    %c0_15 = arith.constant 0 : index
    %c0_16 = arith.constant 0 : index
    %31 = vector.load %arg4[%c2, %c0_15, %c0_16] : memref<3x3x9xf32, #tpu.memory_space<vmem>>, vector<1x3x9xf32>
    %32 = vector.shape_cast %31 : vector<1x3x9xf32> to vector<3x9xf32>
    %cst_17 = arith.constant dense<0.000000e+00> : vector<32x9xf32>
    %33 = tpu.matmul %30, %32, %cst_17 {dimension_numbers = #tpu.dot_dimension_numbers<[1], [0], [0], [1], [0, 0, 1, 1], [], []>} : vector<32x3xf32>, vector<3x9xf32>, vector<32x9xf32> -> vector<32x9xf32>
    %34 = arith.addf %29, %33 : vector<32x9xf32>
    %cst_18 = arith.constant dense<0.000000e+00> : vector<96x9xf32>
    %35 = tpu.matmul %19, %34, %cst_18 {dimension_numbers = #tpu.dot_dimension_numbers<[1], [0], [0], [1], [0, 0, 1, 1], [], []>} : vector<96x32xf32>, vector<32x9xf32>, vector<96x9xf32> -> vector<96x9xf32>
    %36 = vector.extract_strided_slice %35 {offsets = [0, 0], sizes = [32, 9], strides = [1, 1]} : vector<96x9xf32> to vector<32x9xf32>
    %c0_19 = arith.constant 0 : index
    %c0_20 = arith.constant 0 : index
    %c0_21 = arith.constant 0 : index
    %37 = vector.load %arg5[%c0_19, %c0_20, %c0_21] : memref<3x9x27xf32, #tpu.memory_space<vmem>>, vector<1x9x27xf32>
    %38 = vector.shape_cast %37 : vector<1x9x27xf32> to vector<9x27xf32>
    %cst_22 = arith.constant dense<0.000000e+00> : vector<32x27xf32>
    %39 = tpu.matmul %36, %38, %cst_22 {dimension_numbers = #tpu.dot_dimension_numbers<[1], [0], [0], [1], [0, 0, 1, 1], [], []>} : vector<32x9xf32>, vector<9x27xf32>, vector<32x27xf32> -> vector<32x27xf32>
    %40 = vector.extract_strided_slice %35 {offsets = [32, 0], sizes = [32, 9], strides = [1, 1]} : vector<96x9xf32> to vector<32x9xf32>
    %c1_23 = arith.constant 1 : index
    %c0_24 = arith.constant 0 : index
    %c0_25 = arith.constant 0 : index
    %41 = vector.load %arg5[%c1_23, %c0_24, %c0_25] : memref<3x9x27xf32, #tpu.memory_space<vmem>>, vector<1x9x27xf32>
    %42 = vector.shape_cast %41 : vector<1x9x27xf32> to vector<9x27xf32>
    %cst_26 = arith.constant dense<0.000000e+00> : vector<32x27xf32>
    %43 = tpu.matmul %40, %42, %cst_26 {dimension_numbers = #tpu.dot_dimension_numbers<[1], [0], [0], [1], [0, 0, 1, 1], [], []>} : vector<32x9xf32>, vector<9x27xf32>, vector<32x27xf32> -> vector<32x27xf32>
    %44 = arith.addf %39, %43 : vector<32x27xf32>
    %45 = vector.extract_strided_slice %35 {offsets = [64, 0], sizes = [32, 9], strides = [1, 1]} : vector<96x9xf32> to vector<32x9xf32>
    %c2_27 = arith.constant 2 : index
    %c0_28 = arith.constant 0 : index
    %c0_29 = arith.constant 0 : index
    %46 = vector.load %arg5[%c2_27, %c0_28, %c0_29] : memref<3x9x27xf32, #tpu.memory_space<vmem>>, vector<1x9x27xf32>
    %47 = vector.shape_cast %46 : vector<1x9x27xf32> to vector<9x27xf32>
    %cst_30 = arith.constant dense<0.000000e+00> : vector<32x27xf32>
    %48 = tpu.matmul %45, %47, %cst_30 {dimension_numbers = #tpu.dot_dimension_numbers<[1], [0], [0], [1], [0, 0, 1, 1], [], []>} : vector<32x9xf32>, vector<9x27xf32>, vector<32x27xf32> -> vector<32x27xf32>
    %49 = arith.addf %44, %48 : vector<32x27xf32>
    %c0_31 = arith.constant 0 : index
    %c0_32 = arith.constant 0 : index
    %50 = vector.load %arg6[%c0_31, %c0_32] : memref<3x3xf32, #tpu.memory_space<vmem>>, vector<3x3xf32>
    %cst_33 = arith.constant dense<0.000000e+00> : vector<32x3xf32>
    %51 = tpu.matmul %17, %50, %cst_33 {dimension_numbers = #tpu.dot_dimension_numbers<[1], [0], [0], [1], [0, 0, 1, 1], [], []>} : vector<32x3xf32>, vector<3x3xf32>, vector<32x3xf32> -> vector<32x3xf32>
    %52 = arith.mulf %17, %51 : vector<32x3xf32>
    %c0_34 = arith.constant 0 : index
    %c0_35 = arith.constant 0 : index
    %53 = vector.load %arg9[%c0_34, %c0_35] : memref<3x13xf32, #tpu.memory_space<vmem>>, vector<3x13xf32>
    %cst_36 = arith.constant dense<0.000000e+00> : vector<32x13xf32>
    %54 = tpu.matmul %52, %53, %cst_36 {dimension_numbers = #tpu.dot_dimension_numbers<[1], [0], [0], [1], [0, 0, 1, 1], [], []>} : vector<32x3xf32>, vector<3x13xf32>, vector<32x13xf32> -> vector<32x13xf32>
    %c0_37 = arith.constant 0 : index
    %c0_38 = arith.constant 0 : index
    %55 = vector.load %arg7[%c0_37, %c0_38] : memref<3x9xf32, #tpu.memory_space<vmem>>, vector<3x9xf32>
    %cst_39 = arith.constant dense<0.000000e+00> : vector<32x9xf32>
    %56 = tpu.matmul %17, %55, %cst_39 {dimension_numbers = #tpu.dot_dimension_numbers<[1], [0], [0], [1], [0, 0, 1, 1], [], []>} : vector<32x3xf32>, vector<3x9xf32>, vector<32x9xf32> -> vector<32x9xf32>
    %57 = arith.mulf %34, %56 : vector<32x9xf32>
    %c0_40 = arith.constant 0 : index
    %c0_41 = arith.constant 0 : index
    %58 = vector.load %arg10[%c0_40, %c0_41] : memref<9x13xf32, #tpu.memory_space<vmem>>, vector<9x13xf32>
    %cst_42 = arith.constant dense<0.000000e+00> : vector<32x13xf32>
    %59 = tpu.matmul %57, %58, %cst_42 {dimension_numbers = #tpu.dot_dimension_numbers<[1], [0], [0], [1], [0, 0, 1, 1], [], []>} : vector<32x9xf32>, vector<9x13xf32>, vector<32x13xf32> -> vector<32x13xf32>
    %60 = arith.addf %54, %59 : vector<32x13xf32>
    %c0_43 = arith.constant 0 : index
    %c0_44 = arith.constant 0 : index
    %61 = vector.load %arg8[%c0_43, %c0_44] : memref<3x27xf32, #tpu.memory_space<vmem>>, vector<3x27xf32>
    %cst_45 = arith.constant dense<0.000000e+00> : vector<32x27xf32>
    %62 = tpu.matmul %17, %61, %cst_45 {dimension_numbers = #tpu.dot_dimension_numbers<[1], [0], [0], [1], [0, 0, 1, 1], [], []>} : vector<32x3xf32>, vector<3x27xf32>, vector<32x27xf32> -> vector<32x27xf32>
    %63 = arith.mulf %49, %62 : vector<32x27xf32>
    %c0_46 = arith.constant 0 : index
    %c0_47 = arith.constant 0 : index
    %64 = vector.load %arg11[%c0_46, %c0_47] : memref<27x13xf32, #tpu.memory_space<vmem>>, vector<27x13xf32>
    %cst_48 = arith.constant dense<0.000000e+00> : vector<32x13xf32>
    %65 = tpu.matmul %63, %64, %cst_48 {dimension_numbers = #tpu.dot_dimension_numbers<[1], [0], [0], [1], [0, 0, 1, 1], [], []>} : vector<32x27xf32>, vector<27x13xf32>, vector<32x13xf32> -> vector<32x13xf32>
    %66 = arith.addf %60, %65 : vector<32x13xf32>
    %67 = math.tanh %66 : vector<32x13xf32>
    %c0_49 = arith.constant 0 : index
    %c0_50 = arith.constant 0 : index
    %68 = vector.load %arg12[%c0_49, %c0_50] : memref<13x16xf32, #tpu.memory_space<vmem>>, vector<13x16xf32>
    %cst_51 = arith.constant dense<0.000000e+00> : vector<32x16xf32>
    %69 = tpu.matmul %67, %68, %cst_51 {dimension_numbers = #tpu.dot_dimension_numbers<[1], [0], [0], [1], [0, 0, 1, 1], [], []>} : vector<32x13xf32>, vector<13x16xf32>, vector<32x16xf32> -> vector<32x16xf32>
    %c0_52 = arith.constant 0 : index
    %c0_53 = arith.constant 0 : index
    %70 = vector.load %arg13[%c0_52, %c0_53] : memref<1x16xf32, #tpu.memory_space<vmem>>, vector<1x16xf32>
    %71 = vector.broadcast %70 : vector<1x16xf32> to vector<32x16xf32>
    %72 = arith.addf %69, %71 : vector<32x16xf32>
    %cst_54 = arith.constant dense<0.000000e+00> : vector<16xf32>
    %73 = vector.multi_reduction <add>, %72, %cst_54 [0] : vector<32x16xf32> to vector<16xf32>
    %74 = vector.shape_cast %73 : vector<16xf32> to vector<1x16xf32>
    %cst_55 = arith.constant 3.200000e+01 : f32
    %75 = vector.broadcast %cst_55 : f32 to vector<1x16xf32>
    %76 = arith.divf %74, %75 : vector<1x16xf32>
    %77 = arith.mulf %72, %72 : vector<32x16xf32>
    %cst_56 = arith.constant dense<0.000000e+00> : vector<16xf32>
    %78 = vector.multi_reduction <add>, %77, %cst_56 [0] : vector<32x16xf32> to vector<16xf32>
    %79 = vector.shape_cast %78 : vector<16xf32> to vector<1x16xf32>
    %cst_57 = arith.constant 3.200000e+01 : f32
    %80 = vector.broadcast %cst_57 : f32 to vector<1x16xf32>
    %81 = arith.divf %79, %80 : vector<1x16xf32>
    %82 = arith.mulf %76, %76 : vector<1x16xf32>
    %83 = arith.subf %81, %82 : vector<1x16xf32>
    %84 = vector.broadcast %76 : vector<1x16xf32> to vector<32x16xf32>
    %85 = arith.subf %72, %84 : vector<32x16xf32>
    %c0_58 = arith.constant 0 : index
    %c0_59 = arith.constant 0 : index
    %86 = vector.load %arg14[%c0_58, %c0_59] : memref<1x16xf32, #tpu.memory_space<vmem>>, vector<1x16xf32>
    %cst_60 = arith.constant 9.99999974E-6 : f32
    %87 = vector.broadcast %cst_60 : f32 to vector<1x16xf32>
    %88 = arith.addf %83, %87 : vector<1x16xf32>
    %89 = math.rsqrt %88 : vector<1x16xf32>
    %90 = arith.mulf %86, %89 : vector<1x16xf32>
    %91 = vector.broadcast %90 : vector<1x16xf32> to vector<32x16xf32>
    %92 = arith.mulf %85, %91 : vector<32x16xf32>
    %c0_61 = arith.constant 0 : index
    %c0_62 = arith.constant 0 : index
    %93 = vector.load %arg15[%c0_61, %c0_62] : memref<1x16xf32, #tpu.memory_space<vmem>>, vector<1x16xf32>
    %94 = vector.broadcast %93 : vector<1x16xf32> to vector<32x16xf32>
    %95 = arith.addf %92, %94 : vector<32x16xf32>
    %cst_63 = arith.constant 0.000000e+00 : f32
    %96 = vector.broadcast %cst_63 : f32 to vector<32x16xf32>
    %97 = arith.maximumf %95, %96 : vector<32x16xf32>
    %c0_64 = arith.constant 0 : index
    %c0_65 = arith.constant 0 : index
    %98 = vector.load %arg16[%c0_64, %c0_65] : memref<16x3xf32, #tpu.memory_space<vmem>>, vector<16x3xf32>
    %cst_66 = arith.constant dense<0.000000e+00> : vector<32x3xf32>
    %99 = tpu.matmul %97, %98, %cst_66 {dimension_numbers = #tpu.dot_dimension_numbers<[1], [0], [0], [1], [0, 0, 1, 1], [], []>} : vector<32x16xf32>, vector<16x3xf32>, vector<32x3xf32> -> vector<32x3xf32>
    %c0_67 = arith.constant 0 : index
    %c0_68 = arith.constant 0 : index
    %100 = vector.load %arg17[%c0_67, %c0_68] : memref<1x3xf32, #tpu.memory_space<vmem>>, vector<1x3xf32>
    %101 = vector.broadcast %100 : vector<1x3xf32> to vector<32x3xf32>
    %102 = arith.addf %99, %101 : vector<32x3xf32>
    %c0_69 = arith.constant 0 : index
    %c0_70 = arith.constant 0 : index
    %c0_71 = arith.constant 0 : index
    %103 = vector.load %arg18[%c0_69, %c0_70, %c0_71] : memref<1x32x3xf32, #tpu.memory_space<vmem>>, vector<1x32x3xf32>
    %104 = vector.shape_cast %103 : vector<1x32x3xf32> to vector<32x3xf32>
    %105 = vector.shape_cast %102 : vector<32x3xf32> to vector<1x32x3xf32>
    tpu.vector_store %arg18[%c0_69, %c0_70, %c0_71], %105 {strides = array<i32>} : memref<1x32x3xf32, #tpu.memory_space<vmem>>, vector<1x32x3xf32>,
    return
  }
  func.func @transform_0(%arg0: i32) -> (i32, i32, i32) {
    %c0_i32 = arith.constant 0 : i32
    %c0_i32_0 = arith.constant 0 : i32
    %c0_i32_1 = arith.constant 0 : i32
    return %arg0, %c0_i32, %c0_i32_0 : i32, i32, i32
  }
  func.func @transform_1(%arg0: i32) -> (i32, i32, i32) {
    %c0_i32 = arith.constant 0 : i32
    %c0_i32_0 = arith.constant 0 : i32
    %c0_i32_1 = arith.constant 0 : i32
    return %arg0, %c0_i32, %c0_i32_0 : i32, i32, i32
  }
  func.func @transform_2(%arg0: i32) -> (i32, i32, i32) {
    %c0_i32 = arith.constant 0 : i32
    %c0_i32_0 = arith.constant 0 : i32
    %c0_i32_1 = arith.constant 0 : i32
    return %arg0, %c0_i32, %c0_i32_0 : i32, i32, i32
  }
  func.func @transform_3(%arg0: i32) -> (i32, i32, i32) {
    %c0_i32 = arith.constant 0 : i32
    %c0_i32_0 = arith.constant 0 : i32
    %c0_i32_1 = arith.constant 0 : i32
    %c0_i32_2 = arith.constant 0 : i32
    return %c0_i32, %c0_i32_0, %c0_i32_1 : i32, i32, i32
  }
  func.func @transform_4(%arg0: i32) -> (i32, i32, i32) {
    %c0_i32 = arith.constant 0 : i32
    %c0_i32_0 = arith.constant 0 : i32
    %c0_i32_1 = arith.constant 0 : i32
    %c0_i32_2 = arith.constant 0 : i32
    return %c0_i32, %c0_i32_0, %c0_i32_1 : i32, i32, i32
  }
  func.func @transform_5(%arg0: i32) -> (i32, i32) {
    %c0_i32 = arith.constant 0 : i32
    %c0_i32_0 = arith.constant 0 : i32
    %c0_i32_1 = arith.constant 0 : i32
    return %c0_i32, %c0_i32_0 : i32, i32
  }
  func.func @transform_6(%arg0: i32) -> (i32, i32) {
    %c0_i32 = arith.constant 0 : i32
    %c0_i32_0 = arith.constant 0 : i32
    %c0_i32_1 = arith.constant 0 : i32
    return %c0_i32, %c0_i32_0 : i32, i32
  }
  func.func @transform_7(%arg0: i32) -> (i32, i32) {
    %c0_i32 = arith.constant 0 : i32
    %c0_i32_0 = arith.constant 0 : i32
    %c0_i32_1 = arith.constant 0 : i32
    return %c0_i32, %c0_i32_0 : i32, i32
  }
  func.func @transform_8(%arg0: i32) -> (i32, i32) {
    %c0_i32 = arith.constant 0 : i32
    %c0_i32_0 = arith.constant 0 : i32
    %c0_i32_1 = arith.constant 0 : i32
    return %c0_i32, %c0_i32_0 : i32, i32
  }
  func.func @transform_9(%arg0: i32) -> (i32, i32) {
    %c0_i32 = arith.constant 0 : i32
    %c0_i32_0 = arith.constant 0 : i32
    %c0_i32_1 = arith.constant 0 : i32
    return %c0_i32, %c0_i32_0 : i32, i32
  }
  func.func @transform_10(%arg0: i32) -> (i32, i32) {
    %c0_i32 = arith.constant 0 : i32
    %c0_i32_0 = arith.constant 0 : i32
    %c0_i32_1 = arith.constant 0 : i32
    return %c0_i32, %c0_i32_0 : i32, i32
  }
  func.func @transform_11(%arg0: i32) -> (i32, i32) {
    %c0_i32 = arith.constant 0 : i32
    %c0_i32_0 = arith.constant 0 : i32
    %c0_i32_1 = arith.constant 0 : i32
    return %c0_i32, %c0_i32_0 : i32, i32
  }
  func.func @transform_12(%arg0: i32) -> (i32, i32) {
    %c0_i32 = arith.constant 0 : i32
    %c0_i32_0 = arith.constant 0 : i32
    %c0_i32_1 = arith.constant 0 : i32
    return %c0_i32, %c0_i32_0 : i32, i32
  }
  func.func @transform_13(%arg0: i32) -> (i32, i32) {
    %c0_i32 = arith.constant 0 : i32
    %c0_i32_0 = arith.constant 0 : i32
    %c0_i32_1 = arith.constant 0 : i32
    return %c0_i32, %c0_i32_0 : i32, i32
  }
  func.func @transform_14(%arg0: i32) -> (i32, i32) {
    %c0_i32 = arith.constant 0 : i32
    %c0_i32_0 = arith.constant 0 : i32
    %c0_i32_1 = arith.constant 0 : i32
    return %c0_i32, %c0_i32_0 : i32, i32
  }
  func.func @transform_15(%arg0: i32) -> (i32, i32) {
    %c0_i32 = arith.constant 0 : i32
    %c0_i32_0 = arith.constant 0 : i32
    %c0_i32_1 = arith.constant 0 : i32
    return %c0_i32, %c0_i32_0 : i32, i32
  }
  func.func @transform_16(%arg0: i32) -> (i32, i32) {
    %c0_i32 = arith.constant 0 : i32
    %c0_i32_0 = arith.constant 0 : i32
    %c0_i32_1 = arith.constant 0 : i32
    return %c0_i32, %c0_i32_0 : i32, i32
  }
  func.func @transform_17(%arg0: i32) -> (i32, i32, i32) {
    %c0_i32 = arith.constant 0 : i32
    %c0_i32_0 = arith.constant 0 : i32
    %c0_i32_1 = arith.constant 0 : i32
    return %arg0, %c0_i32, %c0_i32_0 : i32, i32, i32
  }
}

</mosaic_0001>

<bundles_post_ra>
// kernel: marble_forward.1
= control target key start
LH: loop header
LB: loop body
LE: loop exit
PB: predicated region body
PF: predicated region fallthrough
CT: control target
= control target key end

     0   :  { %s3236_s24 = smov 0   ;;  %s3581_s0 = inlined_call_operand.vmem [shape: f32[2,32,3], index: 0, kind: input, shape index: {}]   ;;  %s3582_s1 = inlined_call_operand.vmem [shape: f32[2,32,9], index: 1, kind: input, shape index: {}]   ;;  %s3583_s2 = inlined_call_operand.vmem [shape: f32[2,96,32], index: 2, kind: input, shape index: {}]   ;;  %s3584_s3 = inlined_call_operand.vmem [shape: f32[3,3,9], index: 3, kind: input, shape index: {}]   ;;  %s3585_s4 = inlined_call_operand.vmem [shape: f32[3,9,27], index: 4, kind: input, shape index: {}]   ;;  %s3586_s5 = inlined_call_operand.vmem [shape: f32[3,3], index: 5, kind: input, shape index: {}]   ;;  %s3587_s6 = inlined_call_operand.vmem [shape: f32[3,9], index: 6, kind: input, shape index: {}]   ;;  %s3588_s7 = inlined_call_operand.vmem [shape: f32[3,27], index: 7, kind: input, shape index: {}]   ;;  %s3589_s8 = inlined_call_operand.vmem [shape: f32[3,13], index: 8, kind: input, shape index: {}]   ;;  %s3590_s9 = inlined_call_operand.vmem [shape: f32[9,13], index: 9, kind: input, shape index: {}]   ;;  %s3591_s10 = inlined_call_operand.vmem [shape: f32[27,13], index: 10, kind: input, shape index: {}]   ;;  %s3592_s11 = inlined_call_operand.vmem [shape: f32[13,16], index: 11, kind: input, shape index: {}]   ;;  %s3593_s12 = inlined_call_operand.vmem [shape: f32[1,16], index: 12, kind: input, shape index: {}]   ;;  %s3594_s13 = inlined_call_operand.vmem [shape: f32[1,16], index: 13, kind: input, shape index: {}]   ;;  %s3595_s14 = inlined_call_operand.vmem [shape: f32[1,16], index: 14, kind: input, shape index: {}]   ;;  %s3596_s15 = inlined_call_operand.vmem [shape: f32[16,3], index: 15, kind: input, shape index: {}]   ;;  %s3597_s16 = inlined_call_operand.vmem [shape: f32[1,3], index: 16, kind: input, shape index: {}]   ;;  %s3598_s17 = inlined_call_operand.vmem [shape: f32[2,32,3], index: 17, kind: output, shape index: {}]  }
   0x1   :  { %3599 = sst [smem:[#allocation2_spill]] %s3581_s0 }
   0x2   :  { %3600 = sst [smem:[#allocation3_spill]] %s3582_s1 }
   0x3 LB: > { %s2601_s25 = sadd.s32 4294967295, %s3138_s24   ;;  %p2605_p0 = scmp.ge.s32.totalorder %s3138_s24, 1  ;;  %s3138_s24 = sphi %s3236_s24, %s27_s24  }
   0x4   : > { %p507_p1 = scmp.lt.s32.totalorder %s3138_s24, 3 }
   0x6   : > { %p508_p2 = pnand %p2605_p0, %p507_p1 }
   0x7   : > { %p569_p3 = scmp.lt.s32.totalorder (!%p508_p2), %s2601_s25, 1  ;;  %v3140_v0 = vmov (!%p508_p2), 2   ;;  %v3141_v1 = vmov (!%p508_p2), 1   ;;  %s3601_s29 = sld [smem:[#allocation2_spill]] (!%p508_p2)  ;;  %v3142_v6 = vmov (!%p508_p2), 0   ;;  %vm713_vm0 = vcmask (!%p508_p2), 261120  }
   0x8   : > { %511 = sbr.rel (%p508_p2) target bundleno = 1938 (0x792), region = 88  ;;  %3115 = vset.pattern.permute.xlu1 (!%p508_p2), %v3140_v0  ;;  %3114 = vset.pattern.permute.xlu0 (!%p508_p2), %v3141_v1  ;;  %s3602_s19 = sld [smem:[#allocation3_spill]] (!%p508_p2)  ;;  %vm891_vm1 = vcmask (!%p508_p2), 1042432   ;;  %vm878_vm2 = vcmask (!%p508_p2), 23552   ;;  %vm1329_vm3 = vcmask (!%p508_p2), 1040384   ;;  %vm3145_vm4 = vmmov (!%p508_p2), 1  }
   0x9   : > { %s3143_s20 = smov (!%p508_p2), 125   ;;  %s3144_s22 = smov (!%p508_p2), 122   ;;  %vm3371_vm5 = vmpackc.low (!%p508_p2), %vm1329_vm3, %vm3145_vm4  ;;  %vm1316_vm6 = vcmask (!%p508_p2), 72704   ;;  %vm2123_vm8 = vcmask (!%p508_p2), 220160   ;;  %vm2254_vm9 = vcmask (!%p508_p2), 1044480   ;;  %vm2241_vm11 = vcmask (!%p508_p2), 105472  }
   0xa   : > { %vm3058_vm7 = vmpackc.low (!%p508_p2), %vm891_vm1, %vm3145_vm4  ;;  %vm2343_vm12 = vcmask (!%p508_p2), 130048  }
   0xb   : > { %vm3064_vm10 = vmpackc.low (!%p508_p2), %vm2254_vm9, %vm3145_vm4 }
   0xf   : > { %s3606_s25 = smov (!%p569_p3, %s2601_s25), 1 }
  0x10   : > { %s3247_s26 = sshll.u32 %s3606_s25, 5  ;;  %s3099_s21 = smul.u32 96, %s3606_s25 }
  0x11   : > { %s573_s0 = scalar_lea.vmem %s3601_s29, %s3247_s26  ;;  %s578_s1 = scalar_lea.vmem %s3602_s19, %s3247_s26 }
  0x12   : > { %v589_v2 = vld [vmem:[%s573_s0] sm:$0xff]  ;;  %v590_v3 = vld [vmem:[%s573_s0 + $0x8] sm:$0xff]  ;;  %v591_v4 = vld [vmem:[%s573_s0 + $0x10] sm:$0xff]  ;;  %s3261_s28 = scalar_lea.vmem %s3583_s2, %s3099_s21  ;;  %s588_s18 = scalar_lea.vmem %s3598_s17, %s3247_s26 }
  0x13   : > { %662 = vperm.xlu1 %3115, %v589_v2   ;;  %622 = vperm.xlu0 %3114, %v589_v2   ;;  %v592_v5 = vld [vmem:[%s573_s0 + $0x18] sm:$0xff]  ;;  %v593_v7 = vld [vmem:[%s578_s1] sm:$0xff]  ;;  %v594_v11 = vld [vmem:[%s578_s1 + $0x8] sm:$0xff] }
  0x14   : > { %v595_v16 = vld [vmem:[%s578_s1 + $0x10] sm:$0xff]  ;;  %v596_v18 = vld [vmem:[%s578_s1 + $0x18] sm:$0xff]  ;;  %v3264_v23 = vld [vmem:[%s3261_s28] sm:$0xff] }
  0x15   : > { %2839 = vmatprep.mubr.msk.f32.mxu0 %vm713_vm0, %v3264_v23  ;;  %v3281_v54 = vld [vmem:[%s3261_s28 + $0x8] sm:$0xff]  ;;  %v3284_v55 = vld [vmem:[%s3261_s28 + $0x10] sm:$0xff]  ;;  %v3291_v56 = vld [vmem:[%s3261_s28 + $0x18] sm:$0xff] }
  0x16   : > { %v3294_v57 = vld [vmem:[%s3261_s28 + $0x20] sm:$0xff]  ;;  %v3301_v58 = vld [vmem:[%s3261_s28 + $0x28] sm:$0xff]  ;;  %v3304_v59 = vld [vmem:[%s3261_s28 + $0x30] sm:$0xff] }
  0x17   : > { %666 = vperm.xlu1 %3115, %v590_v3   ;;  %626 = vperm.xlu0 %3114, %v590_v3   ;;  %v3311_v60 = vld [vmem:[%s3261_s28 + $0x38] sm:$0xff]  ;;  %v3314_v61 = vld [vmem:[%s3261_s28 + $0x40] sm:$0xff]  ;;  %v3321_v62 = vld [vmem:[%s3261_s28 + $0x48] sm:$0xff] }
  0x18   : > { %v3324_v63 = vld [vmem:[%s3261_s28 + $0x50] sm:$0xff] }
  0x1b   : > { %630 = vperm.xlu0 %3114, %v591_v4   ;;  %3116 = vset.pattern.permute.xlu1 %v3141_v1  ;;  %v2625_v1 = vld [vmem:[%s3584_s3 + $0x4] sm:$0x7] }
  0x1c   : > { %634 = vperm.xlu1 %3116, %v592_v5   ;;  %2857 = vmatprep.subr.msk.mxu1 %vm891_vm1, %v2625_v1 }
  0x1d   : > { %2858 = vmatpush3.msk.msra.mxu1 %vm891_vm1, %v2625_v1 }
  0x1f   : > { %3117 = vset.pattern.permute.xlu0 %v3140_v0 }
  0x20   : > { %670 = vperm.xlu0 %3117, %v591_v4   ;;  %3118 = vset.pattern.permute.xlu1 %v3140_v0 }
  0x21   : > { %674 = vperm.xlu1 %3118, %v592_v5  }
  0x24   : > { %3120 = vset.pattern.permute.xlu0 %v3142_v6 }
  0x25   : > { %3119 = vset.pattern.permute.xlu1 %v3142_v6  ;;  %604 = vperm.xlu0 %3120, %v590_v3  }
  0x26   : > { %599 = vperm.xlu1 %3119, %v589_v2   ;;  %v875_v2 = vld [vmem:[%s3584_s3] sm:$0x7] }
  0x27   : > { %2865 = vmatprep.subr.msk.mxu1 %vm891_vm1, %v875_v2 }
  0x29   : > { %3121 = vset.pattern.permute.xlu0 %v3140_v0  ;;  %v3331_v0 = vld [vmem:[%s3261_s28 + $0x58] sm:$0xff] }
  0x2a   : > { %609 = vperm.xlu1 %3119, %v591_v4  }
  0x2e   : > { %614 = vperm.xlu1 %3119, %v592_v5  }
  0x92   : > { %v663_v8 = vpop.permute.xlu1 %662  ;;  %v623_v9 = vpop.permute.xlu0 %622 }
  0x93   : > { %v637_v10 = vmul.f32 %v623_v9, %v593_v7  ;;  %v677_v13 = vmul.f32 %v663_v8, %v593_v7  ;;  %v2636_v9 = vld [vmem:[%s3584_s3 + $0x8] sm:$0x7] }
  0x95   : > { %645 = vrot.lane.b32.xlu0 %v637_v10, %s3143_s20 }
  0x96   : > { %v627_v12 = vpop.permute.xlu0 %626  ;;  %v667_v14 = vpop.permute.xlu1 %666 }
  0x97   : > { %v638_v15 = vmul.f32 %v627_v12, %v594_v11  ;;  %v678_v19 = vmul.f32 %v667_v14, %v594_v11 }
  0x99   : > { %685 = vrot.lane.b32.xlu0 %v677_v13, %s3144_s22  ;;  %647 = vrot.lane.b32.xlu1 %v638_v15, %s3143_s20 }
  0x9a   : > { %v631_v17 = vpop.permute.xlu0 %630 }
  0x9b   : > { %v639_v20 = vmul.f32 %v631_v17, %v595_v16  ;;  %v635_v21 = vpop.permute.xlu1 %634  ;;  %v2655_v17 = vld [vmem:[%s3585_s4 + $0x18] sm:$0x1] }
  0x9c   : > { %v640_v22 = vmul.f32 %v635_v21, %v596_v18 }
  0x9d   : > { %687 = vrot.lane.b32.xlu1 %v678_v19, %s3144_s22  ;;  %649 = vrot.lane.b32.xlu0 %v639_v20, %s3143_s20 }
  0x9f   : > { %v671_v24 = vpop.permute.xlu0 %670 }
  0xa0   : > { %v679_v25 = vmul.f32 %v671_v24, %v595_v16  ;;  %v675_v26 = vpop.permute.xlu1 %674 }
  0xa1   : > { %651 = vrot.lane.b32.xlu1 %v640_v22, %s3143_s20  ;;  %v680_v27 = vmul.f32 %v675_v26, %v596_v18  ;;  %v1311_v26 = vld [vmem:[%s3585_s4] sm:$0xff] }
  0xa2   : > { %689 = vrot.lane.b32.xlu0 %v679_v25, %s3144_s22 }
  0xa4   : > { %v605_v30 = vpop.permute.xlu0 %604 }
  0xa5   : > { %691 = vrot.lane.b32.xlu1 %v680_v27, %s3144_s22  ;;  %v600_v28 = vpop.permute.xlu1 %599  ;;  %v618_v36 = vmul.f32 %v605_v30, %v594_v11  ;;  %v1312_v27 = vld [vmem:[%s3585_s4 + $0x8] sm:$0x1] }
  0xa6   : > { %v617_v35 = vmul.f32 %v600_v28, %v593_v7  ;;  %v3035_v28 = vpack.c.bf16 %v1312_v27, %v1311_v26 }
  0xa9   : > { %v610_v29 = vpop.permute.xlu1 %609 }
  0xaa   : > { %v619_v45 = vmul.f32 %v610_v29, %v595_v16  ;;  %v2654_v16 = vld [vmem:[%s3585_s4 + $0x10] sm:$0xff]  ;;  %v1625_v29 = vld [vmem:[%s3586_s5] sm:$0x7] }
  0xad   : > { %v615_v31 = vpop.permute.xlu1 %614 }
  0xae   : > { %v620_v46 = vmul.f32 %v615_v31, %v596_v18  ;;  %v3029_v18 = vpack.c.bf16 %v2655_v17, %v2654_v16  ;;  %v2121_v16 = vld [vmem:[%s3591_s10 + $0x10] sm:$0xff]  ;;  %v2122_v17 = vld [vmem:[%s3591_s10 + $0x18] sm:$0x7] }
 0x107   : > { %v646_v32 = vpop.permute.xlu0 %645 }
 0x108   : > { %v657_v37 = vadd.f32 %v646_v32, %v617_v35  ;;  %v2667_v35 = vld [vmem:[%s3585_s4 + $0x28] sm:$0x1] }
 0x10b   : > { %v648_v33 = vpop.permute.xlu1 %647  ;;  %v686_v34 = vpop.permute.xlu0 %685 }
 0x10c   : > { %v658_v38 = vadd.f32 %v648_v33, %v618_v36  ;;  %v3268_v41 = vadd.f32 %v686_v34, %v657_v37  ;;  %v2666_v34 = vld [vmem:[%s3585_s4 + $0x20] sm:$0xff] }
 0x10f   : > { %v688_v39 = vpop.permute.xlu1 %687  ;;  %v650_v40 = vpop.permute.xlu0 %649 }
 0x110   : > { %v3270_v42 = vadd.f32 %v688_v39, %v658_v38  ;;  %v659_v48 = vadd.f32 %v650_v40, %v619_v45  ;;  %v3041_v38 = vpack.c.bf16 %v2667_v35, %v2666_v34  ;;  %v1731_v45 = vld [vmem:[%s3587_s6] sm:$0x7] }
 0x112   : > { %v3013_v43 = vpack.c.bf16 %v3270_v42, %v3268_v41 }
 0x113   : > { %v652_v44 = vpop.permute.xlu1 %651 }
 0x114   : > { %3014 = vmatprep.subr.bf16.mxu0 %v3013_v43  ;;  %v690_v47 = vpop.permute.xlu0 %689  ;;  %v660_v49 = vadd.f32 %v652_v44, %v620_v46 }
 0x115   : > { %3016 = vmatpush3.bf16.msra.mxu0 %v3013_v43  ;;  %v3274_v51 = vadd.f32 %v690_v47, %v659_v48  ;;  %v2026_v48 = vld [vmem:[%s3588_s7] sm:$0x7] }
 0x117   : > { %v692_v50 = vpop.permute.xlu1 %691 }
 0x118   : > { %v3276_v52 = vadd.f32 %v692_v50, %v660_v49  ;;  %v1824_v49 = vld [vmem:[%s3590_s9] sm:$0xff]  ;;  %v1825_v50 = vld [vmem:[%s3590_s9 + $0x8] sm:$0x1] }
 0x11a   : > { %v3017_v53 = vpack.c.bf16 %v3276_v52, %v3274_v51 }
 0x11c   : > { %3018 = vmatprep.subr.bf16.mxu0 %v3017_v53 }
 0x11d   : > { %3020 = vmatpush3.bf16.msra.mxu0 %v3017_v53  ;;  %v3047_v53 = vpack.c.bf16 %v1825_v50, %v1824_v49 }
 0x11e   : > { %3031 = vmatprep.subr.msk.bf16.mxu0 %vm3371_vm5, %v3029_v18 }
 0x120   : > { %2840 = vmatmul.mubr.msk.f32.vlgmr.msra.gmra.mrb[0].mxu0 %vm713_vm0, %v3281_v54 }
 0x121   : > { %2842 = vmatprep.mubr.msk.f32.mxu0 %vm713_vm0, %v3284_v55  ;;  %3034 = vmatpush3.bf16.msk.msra.mxu0 %vm3371_vm5, %v3029_v18 }
 0x122   : > { %3037 = vmatprep.subr.msk.bf16.mxu0 %vm3371_vm5, %v3035_v28 }
 0x124   : > { %2843 = vmatmul.mubr.msk.f32.gmra.mrb[2].mxu0 %vm713_vm0, %v3291_v56 }
 0x125   : > { %2845 = vmatprep.mubr.msk.f32.mxu0 %vm713_vm0, %v3294_v57 }
 0x128   : > { %2846 = vmatmul.mubr.msk.f32.gmra.mrb[4].mxu0 %vm713_vm0, %v3301_v58 }
 0x129   : > { %2848 = vmatprep.mubr.msk.f32.mxu0 %vm713_vm0, %v3304_v59 }
 0x12c   : > { %2849 = vmatmul.mubr.msk.f32.gmra.mrb[6].mxu0 %vm713_vm0, %v3311_v60 }
 0x12d   : > { %2851 = vmatprep.mubr.msk.f32.mxu0 %vm713_vm0, %v3314_v61 }
 0x130   : > { %2852 = vmatmul.mubr.msk.f32.gmra.mrb[8].mxu0 %vm713_vm0, %v3321_v62 }
 0x131   : > { %2854 = vmatprep.mubr.msk.f32.mxu0 %vm713_vm0, %v3324_v63 }
 0x134   : > { %2855 = vmatmul.mubr.msk.f32.gmra.mrb[10].mxu0 %vm713_vm0, %v3331_v0 }
 0x1f3   : > { %v2841_v3 = vpop.f32.mrb[0].mxu0 }
 0x1f4   : > { %v816_v4 = vpop.f32.mrb[1].mxu0 }
 0x1f7   : > { %v2844_v5 = vpop.f32.mrb[2].mxu0 }
 0x1f8   : > { %v826_v6 = vpop.f32.mrb[3].mxu0 }
 0x1fb   : > { %v2847_v7 = vpop.f32.mrb[4].mxu0 }
 0x1fc   : > { %v836_v8 = vpop.f32.mrb[5].mxu0 }
 0x1fd   : > { %2859 = vmatprep.mubr.msk.f32.mxu1 %vm878_vm2, %v836_v8 }
 0x1fe   : > { %2860 = vmatmul.mubr.msk.f32.vlgmr.msra.gmra.mrb[0].mxu1 %vm878_vm2, %v2847_v7 }
 0x1ff   : > { %v2850_v10 = vpop.f32.mrb[6].mxu0  ;;  %2866 = vmatpush3.msk.msra.mxu1 %vm891_vm1, %v875_v2 }
 0x200   : > { %v846_v11 = vpop.f32.mrb[7].mxu0  ;;  %2873 = vmatprep.subr.msk.mxu1 %vm891_vm1, %v2636_v9 }
 0x201   : > { %2862 = vmatprep.mubr.msk.f32.mxu1 %vm878_vm2, %v846_v11 }
 0x202   : > { %2863 = vmatmul.mubr.msk.f32.gmra.mrb[2].mxu1 %vm878_vm2, %v2850_v10 }
 0x203   : > { %2867 = vmatprep.mubr.msk.f32.mxu1 %vm878_vm2, %v816_v4  ;;  %v2853_v12 = vpop.f32.mrb[8].mxu0  ;;  %v2119_v4 = vld [vmem:[%s3591_s10] sm:$0xff] }
 0x204   : > { %v856_v13 = vpop.f32.mrb[9].mxu0 }
 0x206   : > { %2868 = vmatmul.mubr.msk.f32.vlgmr.msra.gmra.mrb[0].mxu1 %vm878_vm2, %v2841_v3 }
 0x207   : > { %2870 = vmatprep.mubr.msk.f32.mxu1 %vm878_vm2, %v826_v6  ;;  %2874 = vmatpush3.msk.msra.mxu1 %vm891_vm1, %v2636_v9  ;;  %v2856_v14 = vpop.f32.mrb[10].mxu0 }
 0x208   : > { %v866_v15 = vpop.f32.mrb[11].mxu0 }
 0x20a   : > { %2871 = vmatmul.mubr.msk.f32.gmra.mrb[2].mxu1 %vm878_vm2, %v2844_v5  ;;  %v2120_v5 = vld [vmem:[%s3591_s10 + $0x8] sm:$0xff] }
 0x20b   : > { %2875 = vmatprep.mubr.msk.f32.mxu1 %vm878_vm2, %v856_v13  ;;  %v3053_v9 = vpack.c.bf16 %v2120_v5, %v2119_v4 }
 0x20e   : > { %2876 = vmatmul.mubr.msk.f32.vlgmr.msra.gmra.mrb[0].mxu1 %vm878_vm2, %v2853_v12 }
 0x20f   : > { %2878 = vmatprep.mubr.msk.f32.mxu1 %vm878_vm2, %v866_v15 }
 0x212   : > { %2879 = vmatmul.mubr.msk.f32.gmra.mrb[2].mxu1 %vm878_vm2, %v2856_v14 }
 0x213   : > { %2889 = vmatprep.mubr.msk.f32.mxu1 %vm713_vm0, %v3264_v23 }
 0x2e1   : > { %v3379_v20 = vpop.f32.mrb[0].mxu1 }
 0x2e2   : > { %v3381_v21 = vpop.f32.mrb[1].mxu1 }
 0x2e3   : > { %v3021_v22 = vpack.c.bf16 %v3379_v20, %v3381_v21 }
 0x2e5   : > { %v3385_v23 = vpop.f32.mrb[2].mxu1  ;;  %3022 = vmatprep.subr.bf16.mxu1 %v3021_v22 }
 0x2e6   : > { %v3387_v24 = vpop.f32.mrb[3].mxu1  ;;  %3024 = vmatpush3.bf16.msra.mxu1 %v3021_v22 }
 0x2e7   : > { %v3025_v25 = vpack.c.bf16 %v3385_v23, %v3387_v24 }
 0x2e9   : > { %3026 = vmatprep.subr.bf16.mxu1 %v3025_v25 }
 0x2ea   : > { %3028 = vmatpush3.bf16.msra.mxu1 %v3025_v25 }
 0x2eb   : > { %3073 = vmatprep.subr.msk.bf16.mxu1 %vm3371_vm5, %v3029_v18 }
 0x2ed   : > { %2890 = vmatmul.mubr.msk.f32.vlgmr.msra.gmra.mrb[4].mxu1 %vm713_vm0, %v3281_v54  ;;  %v1730_v54 = vld [vmem:[%s3589_s8] sm:$0x7] }
 0x2ee   : > { %2892 = vmatprep.mubr.msk.f32.mxu1 %vm713_vm0, %v3284_v55  ;;  %3074 = vmatpush3.bf16.msk.msra.mxu1 %vm3371_vm5, %v3029_v18 }
 0x2ef   : > { %2937 = vmatprep.subr.msk.mxu1 %vm891_vm1, %v1625_v29 }
 0x2f1   : > { %2893 = vmatmul.mubr.msk.f32.gmra.mrb[6].mxu1 %vm713_vm0, %v3291_v56 }
 0x2f2   : > { %2895 = vmatprep.mubr.msk.f32.mxu1 %vm713_vm0, %v3294_v57 }
 0x2f5   : > { %2896 = vmatmul.mubr.msk.f32.gmra.mrb[8].mxu1 %vm713_vm0, %v3301_v58 }
 0x2f6   : > { %2898 = vmatprep.mubr.msk.f32.mxu1 %vm713_vm0, %v3304_v59 }
 0x2f9   : > { %2899 = vmatmul.mubr.msk.f32.gmra.mrb[10].mxu1 %vm713_vm0, %v3311_v60 }
 0x2fa   : > { %2901 = vmatprep.mubr.msk.f32.mxu1 %vm713_vm0, %v3314_v61 }
 0x2fd   : > { %2902 = vmatmul.mubr.msk.f32.gmra.mrb[12].mxu1 %vm713_vm0, %v3321_v62 }
 0x2fe   : > { %2904 = vmatprep.mubr.msk.f32.mxu1 %vm713_vm0, %v3324_v63 }
 0x301   : > { %2905 = vmatmul.mubr.msk.f32.gmra.mrb[14].mxu1 %vm713_vm0, %v3331_v0 }
 0x3c0   : > { %v2891_v30 = vpop.f32.mrb[4].mxu1 }
 0x3c1   : > { %v1252_v31 = vpop.f32.mrb[5].mxu1 }
 0x3c4   : > { %v2894_v32 = vpop.f32.mrb[6].mxu1 }
 0x3c5   : > { %v1262_v33 = vpop.f32.mrb[7].mxu1 }
 0x3c8   : > { %v2897_v36 = vpop.f32.mrb[8].mxu1 }
 0x3c9   : > { %v1272_v37 = vpop.f32.mrb[9].mxu1 }
 0x3ca   : > { %2911 = vmatprep.mubr.msk.f32.mxu0 %vm1316_vm6, %v1272_v37  ;;  %v2413_v37 = vld [vmem:[%s3596_s15 + $0x8] sm:$0xff] }
 0x3cb   : > { %2912 = vmatmul.mubr.msk.f32.vlgmr.msra.gmra.mrb[12].mxu0 %vm1316_vm6, %v2897_v36  ;;  %v2412_v36 = vld [vmem:[%s3596_s15] sm:$0xff] }
 0x3cc   : > { %v2900_v39 = vpop.f32.mrb[10].mxu1  ;;  %3040 = vmatpush3.bf16.msk.msra.mxu0 %vm3371_vm5, %v3035_v28  ;;  %2921 = vmatprep.mubr.msk.f32.mxu0 %vm1316_vm6, %v1252_v31 }
 0x3cd   : > { %v1282_v40 = vpop.f32.mrb[11].mxu1  ;;  %3043 = vmatprep.subr.msk.bf16.mxu0 %vm3371_vm5, %v3041_v38 }
 0x3ce   : > { %2914 = vmatprep.mubr.msk.f32.mxu1 %vm1316_vm6, %v1282_v40 }
 0x3cf   : > { %2915 = vmatmul.mubr.msk.f32.vlgmr.msra.gmra.mrb[16].mxu1 %vm1316_vm6, %v2900_v39  ;;  %v2703_v39 = vld [vmem:[%s3593_s12] ss:$0 sm:$0xff] }
 0x3d0   : > { %2939 = vmatprep.mubr.msk.f32.mxu1 %vm878_vm2, %v3268_v41  ;;  %2938 = vmatpush3.msk.msra.mxu1 %vm891_vm1, %v1625_v29  ;;  %v2903_v43 = vpop.f32.mrb[12].mxu1 }
 0x3d1   : > { %v1292_v44 = vpop.f32.mrb[13].mxu1  ;;  %3049 = vmatprep.subr.msk.bf16.mxu1 %vm3371_vm5, %v3047_v53 }
 0x3d3   : > { %2922 = vmatmul.mubr.msk.f32.vlgmr.msra.gmra.mrb[12].mxu0 %vm1316_vm6, %v2891_v30  ;;  %2940 = vmatmul.mubr.msk.f32.vlgmr.msra.gmra.mrb[18].mxu1 %vm878_vm2, %v3270_v42 }
 0x3d4   : > { %2924 = vmatprep.mubr.msk.f32.mxu0 %vm1316_vm6, %v1262_v33  ;;  %3046 = vmatpush3.bf16.msk.msra.mxu0 %vm3371_vm5, %v3041_v38  ;;  %v2906_v46 = vpop.f32.mrb[14].mxu1  ;;  %v3069_v38 = vpack.c.bf16 %v2413_v37, %v2412_v36 }
 0x3d5   : > { %2942 = vmatprep.mubr.msk.f32.mxu1 %vm878_vm2, %v3274_v51  ;;  %2945 = vmatprep.subr.msk.mxu0 %vm891_vm1, %v1731_v45  ;;  %v1302_v47 = vpop.f32.mrb[15].mxu1 }
 0x3d6   : > { %3052 = vmatpush3.bf16.msk.msra.mxu1 %vm3371_vm5, %v3047_v53 }
 0x3d7   : > { %2925 = vmatmul.mubr.msk.f32.gmra.mrb[14].mxu0 %vm1316_vm6, %v2894_v32  ;;  %2943 = vmatmul.mubr.msk.f32.gmra.mrb[20].mxu1 %vm878_vm2, %v3276_v52 }
 0x3d8   : > { %2931 = vmatprep.mubr.msk.f32.mxu0 %vm1316_vm6, %v1292_v44  ;;  %2963 = vmatprep.subr.msk.mxu1 %vm891_vm1, %v1730_v54 }
 0x3db   : > { %2932 = vmatmul.mubr.msk.f32.vlgmr.msra.gmra.mrb[12].mxu0 %vm1316_vm6, %v2903_v43 }
 0x3dc   : > { %2946 = vmatpush3.msk.msra.mxu0 %vm891_vm1, %v1731_v45  ;;  %2934 = vmatprep.mubr.msk.f32.mxu0 %vm1316_vm6, %v1302_v47 }
 0x3dd   : > { %2971 = vmatprep.subr.msk.mxu0 %vm891_vm1, %v2026_v48 }
 0x3df   : > { %2935 = vmatmul.mubr.msk.f32.gmra.mrb[14].mxu0 %vm1316_vm6, %v2906_v46 }
 0x3e0   : > { %2947 = vmatprep.mubr.msk.f32.mxu0 %vm878_vm2, %v3268_v41 }
 0x3e3   : > { %2948 = vmatmul.mubr.msk.f32.vlgmr.msra.gmra.mrb[16].mxu0 %vm878_vm2, %v3270_v42 }
 0x3e4   : > { %2950 = vmatprep.mubr.msk.f32.mxu0 %vm878_vm2, %v3274_v51  ;;  %2972 = vmatpush3.msk.msra.mxu0 %vm891_vm1, %v2026_v48 }
 0x3e7   : > { %2951 = vmatmul.mubr.msk.f32.gmra.mrb[18].mxu0 %vm878_vm2, %v3276_v52 }
 0x3e8   : > { %2973 = vmatprep.mubr.msk.f32.mxu0 %vm878_vm2, %v3268_v41 }
 0x3eb   : > { %2974 = vmatmul.mubr.msk.f32.vlgmr.msra.gmra.mrb[20].mxu0 %vm878_vm2, %v3270_v42 }
 0x3ec   : > { %2976 = vmatprep.mubr.msk.f32.mxu0 %vm878_vm2, %v3274_v51 }
 0x3ef   : > { %2977 = vmatmul.mubr.msk.f32.gmra.mrb[22].mxu0 %vm878_vm2, %v3276_v52 }
 0x4a2   : > { %v2916_v55 = vpop.f32.mrb[16].mxu1 }
 0x4a3   : > { %v1409_v56 = vpop.f32.mrb[17].mxu1 }
 0x4a6   : > { %v2941_v57 = vpop.f32.mrb[18].mxu1 }
 0x4a7   : > { %v1707_v58 = vpop.f32.mrb[19].mxu1 }
 0x4a8   : > { %v1726_v14 = vmul.f32 %v1707_v58, %v3268_v41  ;;  %v1727_v41 = vmul.f32 %v2941_v57, %v3270_v42  ;;  %v2232_v42 = vld [vmem:[%s3592_s11] sm:$0xff] }
 0x4aa   : > { %v2944_v59 = vpop.f32.mrb[20].mxu1 }
 0x4ab   : > { %v1717_v60 = vpop.f32.mrb[21].mxu1  ;;  %v1729_v27 = vmul.f32 %v2944_v59, %v3276_v52 }
 0x4ac   : > { %v1728_v22 = vmul.f32 %v1717_v60, %v3274_v51  ;;  %v2233_v51 = vld [vmem:[%s3592_s11 + $0x8] sm:$0x1f] }
 0x4ad   : > { %v3063_v28 = vpack.c.bf16 %v2233_v51, %v2232_v42  ;;  %v2383_v42 = vld [vmem:[%s3594_s13] sm:$0x1] }
 0x4ae   : > { %v2933_v61 = vpop.f32.mrb[12].mxu0 }
 0x4af   : > { %v1602_v62 = vpop.f32.mrb[13].mxu0  ;;  %3065 = vmatprep.subr.msk.bf16.mxu0 %vm3064_vm10, %v3063_v28 }
 0x4b0   : > { %3068 = vmatpush3.bf16.msk.msra.mxu0 %vm3064_vm10, %v3063_v28 }
 0x4b1   : > { %3070 = vmatprep.subr.bf16.mxu0 %v3069_v38 }
 0x4b2   : > { %v2936_v63 = vpop.f32.mrb[14].mxu0 }
 0x4b3   : > { %v3075_v0 = vadd.f32 %v2936_v63, %v2916_v55  ;;  %v1612_v1 = vpop.f32.mrb[15].mxu0 }
 0x4b4   : > { %v3076_v2 = vadd.f32 %v1612_v1, %v1409_v56 }
 0x4b6   : > { %v2949_v3 = vpop.f32.mrb[16].mxu0 }
 0x4b7   : > { %v1821_v6 = vmul.f32 %v2949_v3, %v3379_v20  ;;  %v1801_v7 = vpop.f32.mrb[17].mxu0 }
 0x4b8   : > { %v1820_v8 = vmul.f32 %v1801_v7, %v3381_v21  ;;  %v3057_v21 = vpack.c.bf16 %v2122_v17, %v2121_v16 }
 0x4ba   : > { %v2952_v10 = vpop.f32.mrb[18].mxu0  ;;  %2957 = vmatprep.mubr.msk.f32.mxu1 %vm1316_vm6, %v1820_v8 }
 0x4bb   : > { %v1823_v11 = vmul.f32 %v2952_v10, %v3385_v23  ;;  %v1811_v12 = vpop.f32.mrb[19].mxu0  ;;  %2958 = vmatmul.mubr.msk.f32.vlgmr.msra.gmra.mrb[22].mxu1 %vm1316_vm6, %v1821_v6 }
 0x4bc   : > { %v1822_v13 = vmul.f32 %v1811_v12, %v3387_v24  ;;  %2964 = vmatpush3.msk.msra.mxu1 %vm891_vm1, %v1730_v54 }
 0x4bd   : > { %3054 = vmatprep.subr.bf16.mxu1 %v3053_v9 }
 0x4be   : > { %2960 = vmatprep.mubr.msk.f32.mxu1 %vm1316_vm6, %v1822_v13  ;;  %v2975_v15 = vpop.f32.mrb[20].mxu0 }
 0x4bf   : > { %v2116_v18 = vmul.f32 %v2975_v15, %v2933_v61  ;;  %2961 = vmatmul.mubr.msk.f32.gmra.mrb[24].mxu1 %vm1316_vm6, %v1823_v11  ;;  %v2096_v19 = vpop.f32.mrb[21].mxu0 }
 0x4c0   : > { %v2115_v20 = vmul.f32 %v2096_v19, %v1602_v62  ;;  %2965 = vmatprep.mubr.msk.f32.mxu1 %vm878_vm2, %v1726_v14 }
 0x4c2   : > { %v2978_v23 = vpop.f32.mrb[22].mxu0 }
 0x4c3   : > { %v2118_v24 = vmul.f32 %v3075_v0, %v2978_v23  ;;  %2966 = vmatmul.mubr.msk.f32.vlgmr.msra.gmra.mrb[22].mxu1 %vm878_vm2, %v1727_v41  ;;  %v2106_v25 = vpop.f32.mrb[23].mxu0 }
 0x4c4   : > { %v2117_v26 = vmul.f32 %v3076_v2, %v2106_v25  ;;  %2968 = vmatprep.mubr.msk.f32.mxu1 %vm878_vm2, %v1728_v22  ;;  %3056 = vmatpush3.bf16.msra.mxu1 %v3053_v9 }
 0x4c5   : > { %3059 = vmatprep.subr.msk.bf16.mxu1 %vm3058_vm7, %v3057_v21 }
 0x4c7   : > { %2969 = vmatmul.mubr.msk.f32.gmra.mrb[24].mxu1 %vm878_vm2, %v1729_v27 }
 0x4c8   : > { %3062 = vmatpush3.bf16.msk.msra.mxu1 %vm3058_vm7, %v3057_v21  ;;  %2987 = vmatprep.mubr.msk.f32.mxu1 %vm2123_vm8, %v2115_v20 }
 0x4cb   : > { %2988 = vmatmul.mubr.msk.f32.vlgmr.msra.gmra.mrb[22].mxu1 %vm2123_vm8, %v2116_v18 }
 0x4cc   : > { %2990 = vmatprep.mubr.msk.f32.mxu1 %vm2123_vm8, %v2117_v26  ;;  %v2388_v26 = vlaneseq }
 0x4ce   : > { %v2389_v27 = vshrl.u32 %v2388_v26, 7 }
 0x4cf   : > { %2991 = vmatmul.mubr.msk.f32.gmra.mrb[24].mxu1 %vm2123_vm8, %v2118_v24 }
 0x4d0   : > { %v2390_v51 = vsub.s32 0, %v2389_v27 }
 0x59e   : > { %v2989_v52 = vpop.f32.mrb[22].mxu1 }
 0x59f   : > { %v2205_v29 = vpop.f32.mrb[23].mxu1 }
 0x5a0   : > { %3122 = vtanh.f32 %v2205_v29 }
 0x5a1   : > { %3124 = vtanh.f32 %v2989_v52 }
 0x5a2   : > { %v2992_v30 = vpop.f32.mrb[24].mxu1 }
 0x5a3   : > { %v2215_v31 = vpop.f32.mrb[25].mxu1 }
 0x5a4   : > { %3126 = vtanh.f32 %v2215_v31 }
 0x5a5   : > { %3128 = vtanh.f32 %v2992_v30  ;;  %v2709_v30 = vld [vmem:[%s3595_s14] ss:$0 sm:$0xff] }
 0x5aa   : > { %v3123_v32 = vpop.eup %3122 }
 0x5ab   : > { %v3125_v33 = vpop.eup %3124  ;;  %2997 = vmatprep.mubr.msk.f32.mxu0 %vm2241_vm11, %v3123_v32 }
 0x5ac   : > { %2998 = vmatmul.mubr.msk.f32.vlgmr.msra.gmra.mrb[24].mxu0 %vm2241_vm11, %v3125_v33 }
 0x5ad   : > { %3072 = vmatpush3.bf16.msra.mxu0 %v3069_v38 }
 0x5ae   : > { %v3127_v34 = vpop.eup %3126 }
 0x5af   : > { %v3129_v35 = vpop.eup %3128  ;;  %3000 = vmatprep.mubr.msk.f32.mxu0 %vm2241_vm11, %v3127_v34 }
 0x5b0   : > { %3001 = vmatmul.mubr.msk.f32.gmra.mrb[26].mxu0 %vm2241_vm11, %v3129_v35 }
 0x67f   : > { %v2999_v40 = vpop.f32.mrb[24].mxu0 }
 0x680   : > { %v2330_v43 = vadd.f32 %v2999_v40, %v2703_v39  ;;  %v2324_v44 = vpop.f32.mrb[25].mxu0 }
 0x681   : > { %v2325_v45 = vadd.f32 %v2703_v39, %v2324_v44 }
 0x682   : > { %v2345_v46 = vsel %vm2343_vm12, %v2330_v43, 0.0  ;;  %v2360_v47 = vmul.f32 %v2330_v43, %v2330_v43 }
 0x683   : > { %v2344_v48 = vsel %vm2343_vm12, %v2325_v45, 0.0  ;;  %v2359_v49 = vmul.f32 %v2325_v45, %v2325_v45  ;;  %v3002_v50 = vpop.f32.mrb[26].mxu0 }
 0x684   : > { %v2364_v53 = vsel %vm2343_vm12, %v2360_v47, 0.0  ;;  %v2346_v54 = vadd.f32 %v2345_v46, %v2344_v48  ;;  %v2340_v55 = vadd.f32 %v3002_v50, %v2703_v39  ;;  %v2334_v56 = vpop.f32.mrb[27].mxu0 }
 0x685   : > { %v2363_v57 = vsel %vm2343_vm12, %v2359_v49, 0.0  ;;  %v2335_v58 = vadd.f32 %v2703_v39, %v2334_v56 }
 0x686   : > { %v2365_v59 = vadd.f32 %v2364_v53, %v2363_v57  ;;  %v2362_v60 = vmul.f32 %v2340_v55, %v2340_v55  ;;  %v2349_v0 = vsel %vm2343_vm12, %v2340_v55, 0.0 }
 0x687   : > { %v2347_v61 = vsel %vm2343_vm12, %v2335_v58, 0.0  ;;  %v2361_v62 = vmul.f32 %v2335_v58, %v2335_v58 }
 0x688   : > { %v2348_v63 = vadd.f32 %v2347_v61, %v2346_v54  ;;  %v2368_v4 = vsel %vm2343_vm12, %v2362_v60, 0.0 }
 0x689   : > { %v2366_v1 = vsel %vm2343_vm12, %v2361_v62, 0.0 }
 0x68a   : > { %v2350_v2 = vadd.f32 %v2349_v0, %v2348_v63  ;;  %v2367_v3 = vadd.f32 %v2366_v1, %v2365_v59 }
 0x68c   : > { %v2351_v5 = vrot.slane %v2350_v2, 4  ;;  %v2369_v6 = vadd.f32 %v2368_v4, %v2367_v3 }
 0x68e   : > { %v2352_v7 = vadd.f32 %v2351_v5, %v2350_v2  ;;  %v2370_v8 = vrot.slane %v2369_v6, 4 }
 0x690   : > { %v2353_v9 = vrot.slane %v2352_v7, 2  ;;  %v2371_v10 = vadd.f32 %v2370_v8, %v2369_v6 }
 0x692   : > { %v2354_v11 = vadd.f32 %v2353_v9, %v2352_v7  ;;  %v2372_v12 = vrot.slane %v2371_v10, 2 }
 0x694   : > { %v2355_v13 = vrot.slane %v2354_v11, 1  ;;  %v2373_v14 = vadd.f32 %v2372_v12, %v2371_v10 }
 0x696   : > { %v2356_v15 = vadd.f32 %v2355_v13, %v2354_v11  ;;  %v2374_v16 = vrot.slane %v2373_v14, 1 }
 0x698   : > { %v2358_v17 = vmul.f32 0.03125, %v2356_v15  ;;  %v2375_v18 = vadd.f32 %v2374_v16, %v2373_v14 }
 0x69a   : > { %v2376_v19 = vmul.f32 0.03125, %v2375_v18  ;;  %v2377_v20 = vmul.f32 %v2358_v17, %v2358_v17  ;;  %v2381_v41 = vsub.f32 %v2335_v58, %v2358_v17  ;;  %v2379_v21 = vsub.f32 %v2325_v45, %v2358_v17  ;;  %v2710_v45 = vld [vmem:[%s3597_s16] ss:$0 sm:$0xff] }
 0x69b   : > { %v2380_v22 = vsub.f32 %v2330_v43, %v2358_v17  ;;  %v2382_v23 = vsub.f32 %v2340_v55, %v2358_v17 }
 0x69c   : > { %v2378_v24 = vsub.f32 %v2376_v19, %v2377_v20 }
 0x69e   : > { %v2384_v25 = vadd.f32 1e-05, %v2378_v24 }
 0x6a0   : > { %3130 = vrsqrt.f32 %v2384_v25 }
 0x6aa   : > { %v3131_v28 = vpop.eup %3130 }
 0x6ab   : > { %v2386_v52 = vmul.f32 %v3131_v28, %v2383_v42 }
 0x6ad   : > { %v2391_v29 = vrot.slane %v2386_v52, %v2390_v51 }
 0x6af   : > { %v2395_v31 = vmul.f32 %v2391_v29, %v2381_v41  ;;  %v2393_v32 = vmul.f32 %v2391_v29, %v2379_v21  ;;  %v2394_v33 = vmul.f32 %v2391_v29, %v2380_v22  ;;  %v2396_v34 = vmul.f32 %v2391_v29, %v2382_v23 }
 0x6b1   : > { %v2404_v35 = vadd.f32 %v2709_v30, %v2393_v32  ;;  %v2405_v36 = vadd.f32 %v2709_v30, %v2394_v33  ;;  %v2406_v37 = vadd.f32 %v2709_v30, %v2395_v31  ;;  %v2407_v40 = vadd.f32 %v2709_v30, %v2396_v34 }
 0x6b3   : > { %v2408_v38 = vmax.f32 %v2404_v35, 0.0  ;;  %v2409_v39 = vmax.f32 %v2405_v36, 0.0  ;;  %v2410_v43 = vmax.f32 %v2406_v37, 0.0  ;;  %v2411_v44 = vmax.f32 %v2407_v40, 0.0 }
 0x6b5   : > { %3007 = vmatprep.mubr.msk.f32.mxu0 %vm2343_vm12, %v2408_v38 }
 0x6b6   : > { %3008 = vmatmul.mubr.msk.f32.vlgmr.msra.gmra.mrb[28].mxu0 %vm2343_vm12, %v2409_v39 }
 0x6b7   : > { %3010 = vmatprep.mubr.msk.f32.mxu0 %vm2343_vm12, %v2410_v43 }
 0x6ba   : > { %3011 = vmatmul.mubr.msk.f32.gmra.mrb[30].mxu0 %vm2343_vm12, %v2411_v44 }
 0x789   : > { %v3009_v46 = vpop.f32.mrb[28].mxu0 }
 0x78a   : > { %v2505_v47 = vadd.f32 %v3009_v46, %v2710_v45  ;;  %v2499_v48 = vpop.f32.mrb[29].mxu0 }
 0x78b   : > { %v2500_v49 = vadd.f32 %v2710_v45, %v2499_v48 }
 0x78c   : > { %2519 = vst.msk [vmem:[%s588_s18 + $0x8] sm:$0xff] %vm878_vm2, %v2505_v47 }
 0x78d   : > { %2518 = vst.msk [vmem:[%s588_s18] sm:$0xff] %vm878_vm2, %v2500_v49  ;;  %v3012_v50 = vpop.f32.mrb[30].mxu0 }
 0x78e   : > { %v2515_v53 = vadd.f32 %v3012_v50, %v2710_v45  ;;  %v2509_v54 = vpop.f32.mrb[31].mxu0 }
 0x78f   : > { %v2510_v55 = vadd.f32 %v2710_v45, %v2509_v54 }
 0x790   : > { %2521 = vst.msk [vmem:[%s588_s18 + $0x18] sm:$0xff] %vm878_vm2, %v2515_v53 }
 0x791   : > { %2520 = vst.msk [vmem:[%s588_s18 + $0x10] sm:$0xff] %vm878_vm2, %v2510_v55 }
 0x792 PF: > { %s27_s24 = sadd.s32 1, %s3138_s24  }
 0x793   : > { %p24_p4 = scmp.ge.s32.totalorder %s27_s24, 4  }
 0x795   :  { %26 = sbr.rel (!%p24_p4) target bundleno = 3 (0x3), region = 128 }

</bundles_post_ra>
